<compile_context>
chip_gen: v7x
topology: tpu7x:2x2x1
jax: 0.10.0
libtpu: 0.0.40
codegen_flags: <defaults>
</compile_context>

<pallas_src>
import numpy as np
import jax
import jax.numpy as jnp
from jax.experimental import pallas as pl
from jax.experimental.pallas import tpu as pltpu


# ----------------------------------------------------------------------------
# Pallas kernel: one row-tile per grid step. Two fused MXU passes + VPU/XLU
# value head + VPU lane-select pack. Weights are VMEM-resident across steps.
# ----------------------------------------------------------------------------
def mlpbase_fused_kernel(
    x_ref,                      # (TN, num_inputs)           f32 VMEM
    w1_ref, b1_ref,             # (num_inputs, 2H), (1, 2H)  fused layer 1
    w2_ref, b2_ref,             # (2H, 2H), (1, 2H)          block-diag layer 2
    clw_ref,                    # (1, 2H)  [0 over actor half | critic_linear w]
    clb_ref,                    # (1,)     SMEM scalar bias
    out_ref,                    # (TN, 2H) out: [hidden_actor | value broadcast]
):
    x = x_ref[...]

    # Layer 1 (actor|critic fused): single lane-dense MXU pass.
    h1 = jnp.dot(x, w1_ref[...], preferred_element_type=jnp.float32) + b1_ref[...]
    h1 = jnp.maximum(h1, 0.0)

    # Layer 2 (block-diagonal fused): single (TN,2H)x(2H,2H) MXU pass.
    h2 = jnp.dot(h1, w2_ref[...], preferred_element_type=jnp.float32) + b2_ref[...]
    h2 = jnp.maximum(h2, 0.0)

    # Value head: VPU multiply + XLU lane reduce. clw is zero over the actor
    # half, so the full-width product reduces exactly to hidden_critic @ clw.
    v = jnp.sum(h2 * clw_ref[...], axis=-1, keepdims=True) + clb_ref[0]   # (TN, 1)

    # Pack one lane-dense output slab: actor lanes keep h2, critic lanes carry
    # the broadcast value. Pure VPU select -- no lane slicing, no extra output.
    half = h2.shape[-1] // 2
    lane = jax.lax.broadcasted_iota(jnp.int32, h2.shape, dimension=1)
    out_ref[...] = jnp.where(lane < half, h2, v)


# ----------------------------------------------------------------------------
# Parameter packing: build the fused / block-diagonal operands once outside
# the kernel (pure layout plumbing, done at parameter-preparation time).
# ----------------------------------------------------------------------------
def pack_fused_params(p):
    h = p["aw2"].shape[0]
    f32 = jnp.float32
    w1 = jnp.concatenate([p["aw1"], p["cw1"]], axis=1).astype(f32)     # (in, 2H)
    b1 = jnp.concatenate([p["ab1"], p["cb1"]], axis=1).astype(f32)     # (1, 2H)
    w2 = jnp.zeros((2 * h, 2 * h), f32)
    w2 = w2.at[:h, :h].set(p["aw2"]).at[h:, h:].set(p["cw2"])          # block-diag
    b2 = jnp.concatenate([p["ab2"], p["cb2"]], axis=1).astype(f32)     # (1, 2H)
    clw = jnp.concatenate(
        [jnp.zeros((1, h), f32), p["clw"].T.astype(f32)], axis=1)      # (1, 2H)
    clb = p["clb"].reshape((1,)).astype(f32)                           # (1,) SMEM
    return {"w1": w1, "b1": b1, "w2": w2, "b2": b2, "clw": clw, "clb": clb}


def _pick_row_tile(n):
    """Row tile: multiple of 8, capped at 1024 (amortizes per-step overhead
    while staying far below the v7x 32 MiB scoped-VMEM default)."""
    return 8 * pl.cdiv(min(max(n, 1), 1024), 8)


def mlpbase_forward(x, fused, hidden_size, rnn_hxs, *, row_tile=None):
    """Runs the fused Pallas kernel; rnn_hxs passed through (non-recurrent)."""
    n, num_inputs = x.shape
    wide = 2 * hidden_size
    # Lane-density requirement of the fused layout (hidden_size=64 -> 128).
    assert wide % 128 == 0, "2*hidden_size must be a multiple of 128"

    if row_tile is None:
        row_tile = _pick_row_tile(n)
    n_pad = row_tile * pl.cdiv(n, row_tile)
    if n_pad != n:
        x = jnp.pad(x, ((0, n_pad - n), (0, 0)))
    grid = (n_pad // row_tile,)

    const = lambda i: (0, 0)                       # weights stay VMEM-resident
    out_slab = pl.pallas_call(
        mlpbase_fused_kernel,
        out_shape=jax.ShapeDtypeStruct((n_pad, wide), jnp.float32),
        grid=grid,
        in_specs=[
            pl.BlockSpec((row_tile, num_inputs), lambda i: (i, 0)),   # x
            pl.BlockSpec((num_inputs, wide), const),                  # w1
            pl.BlockSpec((1, wide), const),                           # b1
            pl.BlockSpec((wide, wide), const),                        # w2
            pl.BlockSpec((1, wide), const),                           # b2
            pl.BlockSpec((1, wide), const),                           # clw
            pl.BlockSpec((1,), lambda i: (0,),
                         memory_space=pltpu.MemorySpace.SMEM),        # clb scalar
        ],
        out_specs=pl.BlockSpec((row_tile, wide), lambda i: (i, 0)),
        compiler_params=pltpu.CompilerParams(
            dimension_semantics=("parallel",)),    # v7x: shard tiles over 2 TCs
    )(x, fused["w1"], fused["b1"], fused["w2"], fused["b2"],
      fused["clw"], fused["clb"])

    hidden_actor = out_slab[:n, :hidden_size]                    # (N, H)
    value = out_slab[:n, hidden_size:hidden_size + 1]            # (N, 1)
    return value, hidden_actor, rnn_hxs


# ----------------------------------------------------------------------------
# Deterministic parameter init (matches PyTorch: orthogonal_ weights with
# gain=sqrt(2), zero biases). Weights stored as (in, out).
# ----------------------------------------------------------------------------
def _orthogonal(key, shape, gain):
    rows, cols = shape
    flat = jax.random.normal(key, (max(rows, cols), min(rows, cols)), dtype=jnp.float32)
    q, r = jnp.linalg.qr(flat)
    q = q * jnp.sign(jnp.diag(r))  # deterministic sign fix
    if rows < cols:
        q = q.T
    return gain * q[:rows, :cols]


def make_params(key, num_inputs, hidden_size):
    gain = float(np.sqrt(2.0))
    keys = jax.random.split(key, 5)
    return {
        # actor
        "aw1": _orthogonal(keys[0], (num_inputs, hidden_size), gain),
        "ab1": jnp.zeros((1, hidden_size), jnp.float32),
        "aw2": _orthogonal(keys[1], (hidden_size, hidden_size), gain),
        "ab2": jnp.zeros((1, hidden_size), jnp.float32),
        # critic
        "cw1": _orthogonal(keys[2], (num_inputs, hidden_size), gain),
        "cb1": jnp.zeros((1, hidden_size), jnp.float32),
        "cw2": _orthogonal(keys[3], (hidden_size, hidden_size), gain),
        "cb2": jnp.zeros((1, hidden_size), jnp.float32),
        # critic_linear (hidden -> 1)
        "clw": _orthogonal(keys[4], (hidden_size, 1), gain),
        "clb": jnp.zeros((1, 1), jnp.float32),
    }


def reference_forward(x, p):
    """Pure-JAX reference of the unfused MLPBase for correctness checking."""
    relu = lambda v: jnp.maximum(v, 0.0)
    ha = relu(relu(x @ p["aw1"] + p["ab1"]) @ p["aw2"] + p["ab2"])
    hc = relu(relu(x @ p["cw1"] + p["cb1"]) @ p["cw2"] + p["cb2"])
    return hc @ p["clw"] + p["clb"], ha


if __name__ == "__main__":
    batch, num_inputs, hidden_size = 8, 32, 64
    key = jax.random.PRNGKey(0)
    k_x, k_p = jax.random.split(key)

    x = jax.random.normal(k_x, (batch, num_inputs), dtype=jnp.float32)
    params = make_params(k_p, num_inputs, hidden_size)
    fused = pack_fused_params(params)
    # non-recurrent: recurrent_hidden_state_size == 1; masks unused in forward
    rnn_hxs = jnp.zeros((batch, 1), jnp.float32)

    value, hidden_actor, rnn_hxs_out = jax.block_until_ready(
        mlpbase_forward(x, fused, hidden_size, rnn_hxs)
    )

    ref_value, ref_actor = reference_forward(x, params)
    np.testing.assert_allclose(np.asarray(value), np.asarray(ref_value),
                               rtol=1e-5, atol=1e-5)
    np.testing.assert_allclose(np.asarray(hidden_actor), np.asarray(ref_actor),
                               rtol=1e-5, atol=1e-5)
    assert value.shape == (batch, 1) and hidden_actor.shape == (batch, hidden_size)
    assert rnn_hxs_out.shape == rnn_hxs.shape

    print("KERNEL_OK")
</pallas_src>

<mosaic_0001>
module attributes {stable_mosaic.version = 11 : i64} {
  func.func @mlpbase_fused_kernel(%arg0: i32, %arg1: memref<8x32xf32, #tpu.memory_space<vmem>>, %arg2: memref<32x128xf32, #tpu.memory_space<vmem>>, %arg3: memref<1x128xf32, #tpu.memory_space<vmem>>, %arg4: memref<128x128xf32, #tpu.memory_space<vmem>>, %arg5: memref<1x128xf32, #tpu.memory_space<vmem>>, %arg6: memref<1x128xf32, #tpu.memory_space<vmem>>, %arg7: memref<1xf32, #tpu.memory_space<smem>>, %arg8: memref<8x128xf32, #tpu.memory_space<vmem>>) attributes {dimension_semantics = [#tpu.dimension_semantics<parallel>], iteration_bounds = array<i64: 1>, scalar_prefetch = 0 : i64, scratch_operands = 0 : i64, tpu.core_type = #tpu.core_type<tc>, window_params = [{transform_indices = @transform_0, window_bounds = array<i64: 8, 32>}, {pipeline_mode = #tpu.pipeline_mode<synchronous>, transform_indices = @transform_1, window_bounds = array<i64: 32, 128>}, {pipeline_mode = #tpu.pipeline_mode<synchronous>, transform_indices = @transform_2, window_bounds = array<i64: 1, 128>}, {pipeline_mode = #tpu.pipeline_mode<synchronous>, transform_indices = @transform_3, window_bounds = array<i64: 128, 128>}, {pipeline_mode = #tpu.pipeline_mode<synchronous>, transform_indices = @transform_4, window_bounds = array<i64: 1, 128>}, {pipeline_mode = #tpu.pipeline_mode<synchronous>, transform_indices = @transform_5, window_bounds = array<i64: 1, 128>}, {transform_indices = @transform_6, window_bounds = array<i64: 1>}, {transform_indices = @transform_7, window_bounds = array<i64: 8, 128>}]} {
    %c0 = arith.constant 0 : index
    %c0_0 = arith.constant 0 : index
    %0 = vector.load %arg1[%c0, %c0_0] : memref<8x32xf32, #tpu.memory_space<vmem>>, vector<8x32xf32>
    %c0_1 = arith.constant 0 : index
    %c0_2 = arith.constant 0 : index
    %1 = vector.load %arg2[%c0_1, %c0_2] : memref<32x128xf32, #tpu.memory_space<vmem>>, vector<32x128xf32>
    %cst = arith.constant dense<0.000000e+00> : vector<8x128xf32>
    %2 = tpu.matmul %0, %1, %cst {dimension_numbers = #tpu.dot_dimension_numbers<[1], [0], [0], [1], [0, 0, 1, 1], [], []>} : vector<8x32xf32>, vector<32x128xf32>, vector<8x128xf32> -> vector<8x128xf32>
    %c0_3 = arith.constant 0 : index
    %c0_4 = arith.constant 0 : index
    %3 = vector.load %arg3[%c0_3, %c0_4] : memref<1x128xf32, #tpu.memory_space<vmem>>, vector<1x128xf32>
    %4 = vector.broadcast %3 : vector<1x128xf32> to vector<8x128xf32>
    %5 = arith.addf %2, %4 : vector<8x128xf32>
    %cst_5 = arith.constant 0.000000e+00 : f32
    %6 = vector.broadcast %cst_5 : f32 to vector<8x128xf32>
    %7 = arith.maximumf %5, %6 : vector<8x128xf32>
    %c0_6 = arith.constant 0 : index
    %c0_7 = arith.constant 0 : index
    %8 = vector.load %arg4[%c0_6, %c0_7] : memref<128x128xf32, #tpu.memory_space<vmem>>, vector<128x128xf32>
    %cst_8 = arith.constant dense<0.000000e+00> : vector<8x128xf32>
    %9 = tpu.matmul %7, %8, %cst_8 {dimension_numbers = #tpu.dot_dimension_numbers<[1], [0], [0], [1], [0, 0, 1, 1], [], []>} : vector<8x128xf32>, vector<128x128xf32>, vector<8x128xf32> -> vector<8x128xf32>
    %c0_9 = arith.constant 0 : index
    %c0_10 = arith.constant 0 : index
    %10 = vector.load %arg5[%c0_9, %c0_10] : memref<1x128xf32, #tpu.memory_space<vmem>>, vector<1x128xf32>
    %11 = vector.broadcast %10 : vector<1x128xf32> to vector<8x128xf32>
    %12 = arith.addf %9, %11 : vector<8x128xf32>
    %cst_11 = arith.constant 0.000000e+00 : f32
    %13 = vector.broadcast %cst_11 : f32 to vector<8x128xf32>
    %14 = arith.maximumf %12, %13 : vector<8x128xf32>
    %c0_12 = arith.constant 0 : index
    %c0_13 = arith.constant 0 : index
    %15 = vector.load %arg6[%c0_12, %c0_13] : memref<1x128xf32, #tpu.memory_space<vmem>>, vector<1x128xf32>
    %16 = vector.broadcast %15 : vector<1x128xf32> to vector<8x128xf32>
    %17 = arith.mulf %14, %16 : vector<8x128xf32>
    %cst_14 = arith.constant dense<0.000000e+00> : vector<8xf32>
    %18 = vector.multi_reduction <add>, %17, %cst_14 [1] : vector<8x128xf32> to vector<8xf32>
    %19 = vector.shape_cast %18 : vector<8xf32> to vector<8x1xf32>
    %c0_15 = arith.constant 0 : index
    %20 = memref.load %arg7[%c0_15] : memref<1xf32, #tpu.memory_space<smem>>
    %21 = vector.broadcast %20 : f32 to vector<8x1xf32>
    %22 = arith.addf %19, %21 : vector<8x1xf32>
    %23 = tpu.iota {dimensions = array<i32: 1>} : vector<8x128xi32>
    %c64_i32 = arith.constant 64 : i32
    %24 = vector.broadcast %c64_i32 : i32 to vector<8x128xi32>
    %25 = arith.cmpi slt, %23, %24 : vector<8x128xi32>
    %26 = vector.shape_cast %22 : vector<8x1xf32> to vector<8x1xf32>
    %27 = vector.broadcast %26 : vector<8x1xf32> to vector<8x128xf32>
    %28 = arith.select %25, %14, %27 : vector<8x128xi1>, vector<8x128xf32>
    %c0_16 = arith.constant 0 : index
    %c0_17 = arith.constant 0 : index
    %29 = vector.load %arg8[%c0_16, %c0_17] : memref<8x128xf32, #tpu.memory_space<vmem>>, vector<8x128xf32>
    tpu.vector_store %arg8[%c0_16, %c0_17], %28 {strides = array<i32>} : memref<8x128xf32, #tpu.memory_space<vmem>>, vector<8x128xf32>,
    return
  }
  func.func @transform_0(%arg0: i32) -> (i32, i32) {
    %c0_i32 = arith.constant 0 : i32
    %c0_i32_0 = arith.constant 0 : i32
    return %arg0, %c0_i32 : i32, i32
  }
  func.func @transform_1(%arg0: i32) -> (i32, i32) {
    %c0_i32 = arith.constant 0 : i32
    %c0_i32_0 = arith.constant 0 : i32
    %c0_i32_1 = arith.constant 0 : i32
    return %c0_i32, %c0_i32_0 : i32, i32
  }
  func.func @transform_2(%arg0: i32) -> (i32, i32) {
    %c0_i32 = arith.constant 0 : i32
    %c0_i32_0 = arith.constant 0 : i32
    %c0_i32_1 = arith.constant 0 : i32
    return %c0_i32, %c0_i32_0 : i32, i32
  }
  func.func @transform_3(%arg0: i32) -> (i32, i32) {
    %c0_i32 = arith.constant 0 : i32
    %c0_i32_0 = arith.constant 0 : i32
    %c0_i32_1 = arith.constant 0 : i32
    return %c0_i32, %c0_i32_0 : i32, i32
  }
  func.func @transform_4(%arg0: i32) -> (i32, i32) {
    %c0_i32 = arith.constant 0 : i32
    %c0_i32_0 = arith.constant 0 : i32
    %c0_i32_1 = arith.constant 0 : i32
    return %c0_i32, %c0_i32_0 : i32, i32
  }
  func.func @transform_5(%arg0: i32) -> (i32, i32) {
    %c0_i32 = arith.constant 0 : i32
    %c0_i32_0 = arith.constant 0 : i32
    %c0_i32_1 = arith.constant 0 : i32
    return %c0_i32, %c0_i32_0 : i32, i32
  }
  func.func @transform_6(%arg0: i32) -> i32 {
    %c0_i32 = arith.constant 0 : i32
    %c0_i32_0 = arith.constant 0 : i32
    return %c0_i32 : i32
  }
  func.func @transform_7(%arg0: i32) -> (i32, i32) {
    %c0_i32 = arith.constant 0 : i32
    %c0_i32_0 = arith.constant 0 : i32
    return %arg0, %c0_i32 : i32, i32
  }
}

</mosaic_0001>

<bundles_post_ra>
// kernel: tpu_custom_call.1
= control target key start
LH: loop header
LB: loop body
LE: loop exit
PB: predicated region body
PF: predicated region fallthrough
CT: control target
= control target key end

     0   :  { %13 = vsyncpa [#allocation4], 0  ;;  %s602_s0 = inlined_call_operand.hbm [shape: f32[8,32], index: 0, kind: input, shape index: {}]   ;;  %s603_s1 = inlined_call_operand.hbm [shape: f32[32,128], index: 1, kind: input, shape index: {}]   ;;  %s604_s2 = inlined_call_operand.vmem [shape: f32[1,128], index: 2, kind: input, shape index: {}]   ;;  %s605_s3 = inlined_call_operand.hbm [shape: f32[128,128], index: 3, kind: input, shape index: {}]   ;;  %s606_s4 = inlined_call_operand.vmem [shape: f32[1,128], index: 4, kind: input, shape index: {}]   ;;  %s607_s5 = inlined_call_operand.vmem [shape: f32[1,128], index: 5, kind: input, shape index: {}]   ;;  %s608_s6 = inlined_call_operand.<no memory space> [shape: f32[1], index: 6, kind: input, shape index: {}]   ;;  %s609_s7 = inlined_call_operand.hbm [shape: f32[8,128], index: 7, kind: output, shape index: {}]  }
   0x1   :  { %14 = vsyncpa [#allocation7], 0 }
   0x2   :  { %15 = vsyncpa [#allocation5], 0  ;;  %s487_s24 = smov [#allocation6]   ;;  %s393_s28 = scalar_lea.hbm %s603_s1, 512 }
   0x3   :  { %s31_s25 = sshll.u32 %s487_s24, 4  ;;  %p394_p0 = scmp.ne.s32.totalorder %s603_s1, %s393_s28  ;;  %s32_s25 = int_to_ptr.vmem [resolvable:$true] %s31_s25 }
   0x4   :  { %p397_p1 = scmp.lt.u32.totalorder %s393_s28, %s603_s1 }
   0x6   :  { %p399_p2 = pnand %p397_p1, %p394_p0 }
   0x8   :  { %402 = shalt.err (!%p399_p2)
}
   0x9   :  { %s403_s10 = scalar_lea.vmem %s32_s25, 512  ;;  %p408_p4 = scmp.lt.s32.totalorder %s32_s25, %s32_s25 }
   0xa   :  { %p404_p3 = scmp.ne.s32.totalorder %s32_s25, %s403_s10  ;;  %p409_p5 = scmp.lt.s32.totalorder %s403_s10, %s403_s10 }
   0xc   :  { %p410_p6 = por %p409_p5, %p408_p4 }
   0xe   :  { %p411_p7 = pnand %p410_p6, %p404_p3 }
  0x10   :  { %414 = shalt.err (!%p411_p7)
}
  0x11   :  { %s488_s11 = smov 128   ;;  %s489_s12 = smov 8  }
  0x12   :  { %37 = dma.hbm_to_vmem [thread:$0]  %s603_s1, 512, %s32_s25, [#allocation7], %s488_s11, %s488_s11, %s489_s12  }
  0x13   :  { %s490_s15 = smov [#allocation3]   ;;  %s491_s17 = smov [#allocation8]  }
  0x14   :  { %s22_s16 = sshll.u32 %s490_s15, 4  ;;  %s45_s18 = sshll.u32 %s491_s17, 4  ;;  %s23_s16 = int_to_ptr.vmem [resolvable:$true] %s22_s16  ;;  %s46_s18 = int_to_ptr.vmem [resolvable:$true] %s45_s18 }
  0x15   :  { %s415_s21 = scalar_lea.hbm %s602_s0, 128 }
  0x16   :  { %p416_p8 = scmp.ne.s32.totalorder %s602_s0, %s415_s21  ;;  %p419_p9 = scmp.lt.u32.totalorder %s415_s21, %s602_s0 }
  0x18   :  { %p421_p10 = pnand %p419_p9, %p416_p8 }
  0x1a   :  { %424 = shalt.err (!%p421_p10)
}
  0x1b   :  { %s425_s1 = scalar_lea.vmem %s23_s16, 128  ;;  %p430_p12 = scmp.lt.s32.totalorder %s23_s16, %s23_s16 }
  0x1c   :  { %p426_p11 = scmp.ne.s32.totalorder %s23_s16, %s425_s1  ;;  %p431_p13 = scmp.lt.s32.totalorder %s425_s1, %s425_s1 }
  0x1e   :  { %p432_p0 = por %p431_p13, %p430_p12 }
  0x20   :  { %p433_p1 = pnand %p432_p0, %p426_p11 }
  0x22   :  { %436 = shalt.err (!%p433_p1)
}
  0x23   :  { %25 = dma.hbm_to_vmem [thread:$0]  %s602_s0, 128, %s23_s16, [#allocation4]  }
  0x24   :  { %s437_s30 = scalar_lea.hbm %s605_s3, 2048 }
  0x25   :  { %p438_p2 = scmp.ne.s32.totalorder %s605_s3, %s437_s30  ;;  %p441_p3 = scmp.lt.u32.totalorder %s437_s30, %s605_s3 }
  0x27   :  { %p443_p4 = pnand %p441_p3, %p438_p2 }
  0x29   :  { %446 = shalt.err (!%p443_p4)
}
  0x2a   :  { %s447_s14 = scalar_lea.vmem %s46_s18, 2048  ;;  %p452_p6 = scmp.lt.s32.totalorder %s46_s18, %s46_s18 }
  0x2b   :  { %p448_p5 = scmp.ne.s32.totalorder %s46_s18, %s447_s14  ;;  %p453_p7 = scmp.lt.s32.totalorder %s447_s14, %s447_s14 }
  0x2d   :  { %p454_p8 = por %p453_p7, %p452_p6 }
  0x2f   :  { %p455_p9 = pnand %p454_p8, %p448_p5 }
  0x31   :  { %458 = shalt.err (!%p455_p9)
}
  0x32   :  { %51 = dma.hbm_to_vmem [thread:$0]  %s605_s3, 2048, %s46_s18, [#allocation7], %s488_s11, %s488_s11, %s489_s12  }
  0x33   :  { %481 = dma.done.wait [#allocation4], 128  }
  0x34   :  { %482 = vsyncadd [#allocation4], 4294967168 }
  0x35   :  { %483 = dma.done.wait [#allocation7], 2560  }
  0x36   :  { %484 = vsyncadd [#allocation7], 4294964736  ;;  %v492_v0 = vmov 0.0|0.0   ;;  %vm493_vm0 = vmmov 0   ;;  %v494_v1 = vmov 0.0   ;;  %v68_v2 = vld [vmem:[#allocation6] sm:$0xff]  ;;  %v261_v45 = vlaneseq }
  0x37   :  { %354 = vmatprep.subr.bf16.mxu0 %v492_v0  ;;  %316 = vmatprep.mubr.msk.f32.mxu0 %vm493_vm0, %v494_v1  ;;  %v69_v3 = vld [vmem:[#allocation6 + $0x8] sm:$0xff]  ;;  %v70_v4 = vld [vmem:[#allocation6 + $0x10] sm:$0xff]  ;;  %v71_v6 = vld [vmem:[#allocation6 + $0x18] sm:$0xff]  ;;  %vm79_vm1 = vcmask 261120   ;;  %v259_v47 = vstv %s608_s6  ;;  %s495_s20 = smov [#allocation9]  }
  0x38   :  { %360 = vmatprep.subr.bf16.mxu1 %v492_v0  ;;  %351 = vmatprep.mubr.msk.f32.mxu1 %vm493_vm0, %v494_v1  ;;  %v355_v5 = vpack.c.bf16 %v69_v3, %v68_v2  ;;  %v154_v7 = vld [vmem:[#allocation8] sm:$0xff]  ;;  %v155_v8 = vld [vmem:[#allocation8 + $0x8] sm:$0xff]  ;;  %v156_v9 = vld [vmem:[#allocation8 + $0x10] sm:$0xff]  ;;  %v358_v11 = vpack.c.bf16 %v71_v6, %v70_v4  ;;  %v262_v46 = vand.u32 127, %v261_v45  ;;  %s272_s21 = sshll.u32 %s495_s20, 4  ;;  %s273_s21 = int_to_ptr.vmem [resolvable:$true] %s272_s21 }
  0x39   :  { %v157_v10 = vld [vmem:[#allocation8 + $0x18] sm:$0xff]  ;;  %v361_v12 = vpack.c.bf16 %v155_v8, %v154_v7  ;;  %v158_v14 = vld [vmem:[#allocation8 + $0x20] sm:$0xff]  ;;  %v159_v15 = vld [vmem:[#allocation8 + $0x28] sm:$0xff]  ;;  %p464_p11 = scmp.lt.s32.totalorder %s273_s21, %s273_s21 }
  0x3a   :  { %356 = vmatpush3.bf16.msra.mxu0 %v355_v5  ;;  %v364_v13 = vpack.c.bf16 %v157_v10, %v156_v9  ;;  %v67_v16 = vld [vmem:[#allocation3] sm:$0xff]  ;;  %v367_v17 = vpack.c.bf16 %v159_v15, %v158_v14  ;;  %v160_v18 = vld [vmem:[#allocation8 + $0x30] sm:$0xff]  ;;  %v162_v21 = vld [vmem:[#allocation8 + $0x40] sm:$0xff]  ;;  %vm263_vm2 = vcmp.lt.s32.totalorder %v262_v46, 64 }
  0x3b   :  { %357 = vmatprep.subr.bf16.mxu0 %v492_v0  ;;  %362 = vmatpush3.bf16.msra.mxu1 %v361_v12  ;;  %v161_v19 = vld [vmem:[#allocation8 + $0x38] sm:$0xff]  ;;  %v163_v22 = vld [vmem:[#allocation8 + $0x48] sm:$0xff]  ;;  %v164_v24 = vld [vmem:[#allocation8 + $0x50] sm:$0xff] }
  0x3c   :  { %363 = vmatprep.subr.bf16.mxu1 %v492_v0  ;;  %v370_v20 = vpack.c.bf16 %v161_v19, %v160_v18  ;;  %v373_v23 = vpack.c.bf16 %v163_v22, %v162_v21  ;;  %v165_v25 = vld [vmem:[#allocation8 + $0x58] sm:$0xff]  ;;  %v166_v27 = vld [vmem:[#allocation8 + $0x60] sm:$0xff]  ;;  %v167_v28 = vld [vmem:[#allocation8 + $0x68] sm:$0xff] }
  0x3d   :  { %v376_v26 = vpack.c.bf16 %v165_v25, %v164_v24  ;;  %v379_v29 = vpack.c.bf16 %v167_v28, %v166_v27  ;;  %v168_v30 = vld [vmem:[#allocation8 + $0x70] sm:$0xff]  ;;  %v169_v31 = vld [vmem:[#allocation8 + $0x78] sm:$0xff] }
  0x3e   :  { %359 = vmatpush3.bf16.msra.mxu0 %v358_v11  ;;  %v382_v32 = vpack.c.bf16 %v169_v31, %v168_v30  ;;  %v282_v33 = vld [vmem:[%s604_s2] ss:$0 sm:$0xff] }
  0x3f   :  { %365 = vmatpush3.bf16.msra.mxu1 %v364_v13  ;;  %v284_v38 = vld [vmem:[%s606_s4] ss:$0 sm:$0xff]  ;;  %s459_s4 = scalar_lea.vmem %s273_s21, 128 }
  0x40   :  { %366 = vmatprep.subr.bf16.mxu1 %v492_v0  ;;  %v285_v42 = vld [vmem:[%s607_s5] ss:$0 sm:$0xff]  ;;  %p460_p10 = scmp.ne.s32.totalorder %s273_s21, %s459_s4  ;;  %p465_p12 = scmp.lt.s32.totalorder %s459_s4, %s459_s4 }
  0x41   :  { %317 = vmatmul.mubr.msk.f32.vlgmr.msra.gmra.mrb[0].mxu0 %vm79_vm1, %v67_v16 }
  0x42   :  { %p466_p13 = por %p465_p12, %p464_p11 }
  0x43   :  { %368 = vmatpush3.bf16.msra.mxu1 %v367_v17 }
  0x44   :  { %369 = vmatprep.subr.bf16.mxu1 %v492_v0  ;;  %p467_p0 = pnand %p466_p13, %p460_p10 }
  0x47   :  { %371 = vmatpush3.bf16.msra.mxu1 %v370_v20 }
  0x48   :  { %372 = vmatprep.subr.bf16.mxu1 %v492_v0 }
  0x4b   :  { %374 = vmatpush3.bf16.msra.mxu1 %v373_v23 }
  0x4c   :  { %375 = vmatprep.subr.bf16.mxu1 %v492_v0 }
  0x4f   :  { %377 = vmatpush3.bf16.msra.mxu1 %v376_v26 }
  0x50   :  { %378 = vmatprep.subr.bf16.mxu1 %v492_v0 }
  0x53   :  { %380 = vmatpush3.bf16.msra.mxu1 %v379_v29 }
  0x54   :  { %381 = vmatprep.subr.bf16.mxu1 %v492_v0 }
  0x57   :  { %383 = vmatpush3.bf16.msra.mxu1 %v382_v32 }
 0x114   :  { %v149_v34 = vpop.f32.mrb[0].mxu0 }
 0x115   :  { %v150_v35 = vadd.f32 %v282_v33, %v149_v34  ;;  %v318_v36 = vpop.f32.mrb[1].mxu0 }
 0x117   :  { %v153_v37 = vmax.f32 %v150_v35, 0.0 }
 0x119   :  { %352 = vmatmul.mubr.f32.vlgmr.msra.gmra.mrb[0].mxu1 %v153_v37 }
 0x1ec   :  { %v243_v39 = vpop.f32.mrb[0].mxu1 }
 0x1ed   :  { %v244_v40 = vadd.f32 %v284_v38, %v243_v39  ;;  %v353_v41 = vpop.f32.mrb[1].mxu1 }
 0x1ef   :  { %v247_v43 = vmax.f32 %v244_v40, 0.0 }
 0x1f1   :  { %v255_v44 = vmul.f32 %v285_v42, %v247_v43 }
 0x1f3   :  { %256 = vadd.xlane.f32.xlu0 %v255_v44 }
 0x280   :  { %v257_v48 = vpop.xlane.xlu0 %256 }
 0x281   :  { %v260_v49 = vadd.f32 %v259_v47, %v257_v48 }
 0x283   :  { %v264_v50 = vsel %vm263_vm2, %v247_v43, %v260_v49 }
 0x284   :  { %265 = vst [vmem:[#allocation9] sm:$0xff] %v264_v50 }
 0x285   :  { %470 = shalt.err (!%p467_p0)
}
 0x286   :  { %s471_s23 = scalar_lea.hbm %s609_s7, 128 }
 0x287   :  { %p472_p1 = scmp.ne.s32.totalorder %s609_s7, %s471_s23  ;;  %p475_p2 = scmp.lt.u32.totalorder %s471_s23, %s609_s7 }
 0x289   :  { %p477_p3 = pnand %p475_p2, %p472_p1 }
 0x28b   :  { %480 = shalt.err (!%p477_p3)
}
 0x28c   :  { %275 = dma.vmem_to_hbm [thread:$0]  %s273_s21, 128, %s609_s7, [#allocation5]  }
 0x28d   :  { %485 = dma.done.wait [#allocation5], 128  }
 0x28e   :  { %486 = vsyncadd [#allocation5], 4294967168 }
 0x28f   :  { %279 = vsyncpa [#allocation4], 1 }
 0x290   :  { %280 = vsyncpa [#allocation7], 1 }
 0x291   :  { %281 = vsyncpa [#allocation5], 1 }

</bundles_post_ra>
